<compile_context>
chip_gen: v7x
topology: tpu7x:2x2x1
jax: 0.10.0
libtpu: 0.0.40
codegen_flags: <defaults>
</compile_context>

<pallas_src>
import math

import jax
import jax.numpy as jnp
from jax.experimental import pallas as pl
from jax.experimental.pallas import tpu as pltpu


def _round_up(v, m):
    return (v + m - 1) // m * m


def _res_gru_kernel(xh_ref, w_ref, b_ref, out_ref):
    Hp = xh_ref.shape[-1] // 2

    xh = xh_ref[...]

    # Single fused MXU pass: [TB, 2Hp] @ [2Hp, 4Hp], f32 accumulate.
    g = jnp.dot(xh.astype(w_ref.dtype), w_ref[...],
                preferred_element_type=jnp.float32) + b_ref[...]

    xh_f = xh.astype(jnp.float32)
    x = xh_f[:, :Hp]          # lane-aligned slice (Hp is a multiple of 128)
    h = xh_f[:, Hp:]

    # Gate slices all start at multiples of Hp -> lane-aligned, no XLU traffic.
    r = jax.nn.sigmoid(g[:, 0 * Hp:1 * Hp])
    z = jax.nn.sigmoid(g[:, 1 * Hp:2 * Hp])
    n = jnp.tanh(g[:, 2 * Hp:3 * Hp] + r * g[:, 3 * Hp:4 * Hp])
    h_new = (1.0 - z) * n + z * h

    # Packed lane-dense output: [ y | h_new ], both halves 128-lane aligned.
    out_ref[:, :Hp] = (x + h_new).astype(out_ref.dtype)
    out_ref[:, Hp:] = h_new.astype(out_ref.dtype)


def pack_gru_params(weight_ii, weight_hh, bias_ii, bias_hh, *,
                    param_dtype=jnp.float32):
    """Pack/transpose GRU parameters ONCE (at parameter-load time).

    weight_ii / weight_hh : [3H, H]   (PyTorch layout)
    bias_ii / bias_hh     : [3H]
    Returns (w_packed [2Hp, 4Hp], b_packed [1, 4Hp]).
    Set param_dtype=jnp.bfloat16 for 2x MXU throughput / half the weight bytes
    (accumulation stays f32 inside the kernel).
    """
    H3, H = weight_ii.shape
    assert H3 == 3 * H and weight_hh.shape == (3 * H, H)
    Hp = _round_up(H, 128)

    wii_t = weight_ii.T.astype(param_dtype)   # [H, 3H]
    whh_t = weight_hh.T.astype(param_dtype)   # [H, 3H]

    w = jnp.zeros((2 * Hp, 4 * Hp), dtype=param_dtype)
    # x-rows (0:H) contribute to gates r, z, n_i
    w = w.at[:H, 0 * Hp:0 * Hp + H].set(wii_t[:, 0:H])
    w = w.at[:H, 1 * Hp:1 * Hp + H].set(wii_t[:, H:2 * H])
    w = w.at[:H, 2 * Hp:2 * Hp + H].set(wii_t[:, 2 * H:3 * H])
    # h-rows (Hp:Hp+H) contribute to gates r, z, n_h
    w = w.at[Hp:Hp + H, 0 * Hp:0 * Hp + H].set(whh_t[:, 0:H])
    w = w.at[Hp:Hp + H, 1 * Hp:1 * Hp + H].set(whh_t[:, H:2 * H])
    w = w.at[Hp:Hp + H, 3 * Hp:3 * Hp + H].set(whh_t[:, 2 * H:3 * H])

    b = jnp.zeros((1, 4 * Hp), dtype=jnp.float32)
    b = b.at[0, 0 * Hp:0 * Hp + H].set(bias_ii[0:H] + bias_hh[0:H])
    b = b.at[0, 1 * Hp:1 * Hp + H].set(bias_ii[H:2 * H] + bias_hh[H:2 * H])
    b = b.at[0, 2 * Hp:2 * Hp + H].set(bias_ii[2 * H:3 * H])
    b = b.at[0, 3 * Hp:3 * Hp + H].set(bias_hh[2 * H:3 * H])
    return w, b


def res_gru_cell(x, h, w_packed, b_packed):
    """ResGRUCell.forward: returns (x + h_new, h_new). x, h: [B, H]."""
    B, H = x.shape
    assert h.shape == (B, H)
    Hp = w_packed.shape[1] // 4
    assert w_packed.shape == (2 * Hp, 4 * Hp)

    # Batch tiling: pad to a sublane multiple; tile at up to 128 rows so a
    # grid axis exists for megacore parallelism once B is non-trivial.
    Bp = _round_up(B, 8)
    TB = Bp if Bp <= 128 else 128
    Bp = _round_up(Bp, TB)
    n_tiles = Bp // TB

    # Pack [x | h] into one lane-dense input slab (padded region is zero).
    xh = jnp.zeros((Bp, 2 * Hp), dtype=x.dtype)
    xh = xh.at[:B, :H].set(x)
    xh = xh.at[:B, Hp:Hp + H].set(h.astype(x.dtype))

    out = pl.pallas_call(
        _res_gru_kernel,
        out_shape=jax.ShapeDtypeStruct((Bp, 2 * Hp), x.dtype),
        grid=(n_tiles,),
        in_specs=[
            pl.BlockSpec((TB, 2 * Hp), lambda i: (i, 0)),        # [x|h] tile
            pl.BlockSpec((2 * Hp, 4 * Hp), lambda i: (0, 0)),    # weights resident
            pl.BlockSpec((1, 4 * Hp), lambda i: (0, 0)),         # bias resident
        ],
        out_specs=pl.BlockSpec((TB, 2 * Hp), lambda i: (i, 0)),
        input_output_aliases={0: 0},   # write [y|h_new] over the [x|h] buffer
        compiler_params=pltpu.CompilerParams(
            dimension_semantics=("parallel",)),
    )(xh, w_packed, b_packed)

    y = out[:B, :H]
    h_new = out[:B, Hp:Hp + H]
    return y, h_new


def _reference(x, h, weight_ii, weight_hh, bias_ii, bias_hh):
    H = x.shape[-1]
    a = x @ weight_ii.T + bias_ii
    b = h @ weight_hh.T + bias_hh
    r = jax.nn.sigmoid(a[:, :H] + b[:, :H])
    z = jax.nn.sigmoid(a[:, H:2 * H] + b[:, H:2 * H])
    n = jnp.tanh(a[:, 2 * H:] + r * b[:, 2 * H:])
    h_new = (1.0 - z) * n + z * h
    return x + h_new, h_new


if __name__ == "__main__":
    B = 2
    H = 32          # input_size == hidden_size for ResGRUCell

    key = jax.random.PRNGKey(0)
    k_x, k_h, k_wii, k_whh, k_bii, k_bhh = jax.random.split(key, 6)

    scale = math.sqrt(1.0 / H)
    x = jax.random.normal(k_x, (B, H), dtype=jnp.float32)
    h = jax.random.normal(k_h, (B, H), dtype=jnp.float32)
    weight_ii = scale * jax.random.normal(k_wii, (3 * H, H), dtype=jnp.float32)
    weight_hh = scale * jax.random.normal(k_whh, (3 * H, H), dtype=jnp.float32)
    bias_ii = scale * jax.random.normal(k_bii, (3 * H,), dtype=jnp.float32)
    bias_hh = scale * jax.random.normal(k_bhh, (3 * H,), dtype=jnp.float32)

    # Parameter packing happens ONCE at load time, not per call.
    w_packed, b_packed = pack_gru_params(weight_ii, weight_hh, bias_ii, bias_hh)

    y, h_new = res_gru_cell(x, h, w_packed, b_packed)
    jax.block_until_ready((y, h_new))

    y_ref, h_ref_out = _reference(x, h, weight_ii, weight_hh, bias_ii, bias_hh)
    assert jnp.allclose(y, y_ref, atol=1e-5, rtol=1e-5), \
        float(jnp.max(jnp.abs(y - y_ref)))
    assert jnp.allclose(h_new, h_ref_out, atol=1e-5, rtol=1e-5), \
        float(jnp.max(jnp.abs(h_new - h_ref_out)))

    print("KERNEL_OK")
</pallas_src>

<mosaic_0001>
module attributes {stable_mosaic.version = 11 : i64} {
  func.func @_res_gru_kernel(%arg0: i32, %arg1: memref<8x256xf32, #tpu.memory_space<vmem>>, %arg2: memref<256x512xf32, #tpu.memory_space<vmem>>, %arg3: memref<1x512xf32, #tpu.memory_space<vmem>>, %arg4: memref<8x256xf32, #tpu.memory_space<vmem>>) attributes {dimension_semantics = [#tpu.dimension_semantics<parallel>], iteration_bounds = array<i64: 1>, scalar_prefetch = 0 : i64, scratch_operands = 0 : i64, tpu.core_type = #tpu.core_type<tc>, window_params = [{transform_indices = @transform_0, window_bounds = array<i64: 8, 256>}, {pipeline_mode = #tpu.pipeline_mode<synchronous>, transform_indices = @transform_1, window_bounds = array<i64: 256, 512>}, {pipeline_mode = #tpu.pipeline_mode<synchronous>, transform_indices = @transform_2, window_bounds = array<i64: 1, 512>}, {transform_indices = @transform_3, window_bounds = array<i64: 8, 256>}]} {
    %c0 = arith.constant 0 : index
    %c0_0 = arith.constant 0 : index
    %0 = vector.load %arg1[%c0, %c0_0] : memref<8x256xf32, #tpu.memory_space<vmem>>, vector<8x256xf32>
    %c0_1 = arith.constant 0 : index
    %c0_2 = arith.constant 0 : index
    %1 = vector.load %arg2[%c0_1, %c0_2] : memref<256x512xf32, #tpu.memory_space<vmem>>, vector<256x512xf32>
    %cst = arith.constant dense<0.000000e+00> : vector<8x512xf32>
    %2 = tpu.matmul %0, %1, %cst {dimension_numbers = #tpu.dot_dimension_numbers<[1], [0], [0], [1], [0, 0, 1, 1], [], []>} : vector<8x256xf32>, vector<256x512xf32>, vector<8x512xf32> -> vector<8x512xf32>
    %c0_3 = arith.constant 0 : index
    %c0_4 = arith.constant 0 : index
    %3 = vector.load %arg3[%c0_3, %c0_4] : memref<1x512xf32, #tpu.memory_space<vmem>>, vector<1x512xf32>
    %4 = vector.broadcast %3 : vector<1x512xf32> to vector<8x512xf32>
    %5 = arith.addf %2, %4 : vector<8x512xf32>
    %6 = vector.extract_strided_slice %0 {offsets = [0, 0], sizes = [8, 128], strides = [1, 1]} : vector<8x256xf32> to vector<8x128xf32>
    %7 = vector.extract_strided_slice %0 {offsets = [0, 128], sizes = [8, 128], strides = [1, 1]} : vector<8x256xf32> to vector<8x128xf32>
    %8 = vector.extract_strided_slice %5 {offsets = [0, 0], sizes = [8, 128], strides = [1, 1]} : vector<8x512xf32> to vector<8x128xf32>
    %9 = arith.negf %8 : vector<8x128xf32>
    %10 = math.exp %9 : vector<8x128xf32>
    %cst_5 = arith.constant 1.000000e+00 : f32
    %11 = vector.broadcast %cst_5 : f32 to vector<8x128xf32>
    %12 = arith.addf %11, %10 : vector<8x128xf32>
    %13 = arith.divf %11, %12 : vector<8x128xf32>
    %14 = vector.extract_strided_slice %5 {offsets = [0, 128], sizes = [8, 128], strides = [1, 1]} : vector<8x512xf32> to vector<8x128xf32>
    %15 = arith.negf %14 : vector<8x128xf32>
    %16 = math.exp %15 : vector<8x128xf32>
    %cst_6 = arith.constant 1.000000e+00 : f32
    %17 = vector.broadcast %cst_6 : f32 to vector<8x128xf32>
    %18 = arith.addf %17, %16 : vector<8x128xf32>
    %19 = arith.divf %17, %18 : vector<8x128xf32>
    %20 = vector.extract_strided_slice %5 {offsets = [0, 256], sizes = [8, 128], strides = [1, 1]} : vector<8x512xf32> to vector<8x128xf32>
    %21 = vector.extract_strided_slice %5 {offsets = [0, 384], sizes = [8, 128], strides = [1, 1]} : vector<8x512xf32> to vector<8x128xf32>
    %22 = arith.mulf %13, %21 : vector<8x128xf32>
    %23 = arith.addf %20, %22 : vector<8x128xf32>
    %24 = math.tanh %23 : vector<8x128xf32>
    %cst_7 = arith.constant 1.000000e+00 : f32
    %25 = vector.broadcast %cst_7 : f32 to vector<8x128xf32>
    %26 = arith.subf %25, %19 : vector<8x128xf32>
    %27 = arith.mulf %26, %24 : vector<8x128xf32>
    %28 = arith.mulf %19, %7 : vector<8x128xf32>
    %29 = arith.addf %27, %28 : vector<8x128xf32>
    %30 = arith.addf %6, %29 : vector<8x128xf32>
    %c0_8 = arith.constant 0 : index
    %c0_9 = arith.constant 0 : index
    %31 = vector.load %arg4[%c0_8, %c0_9] : memref<8x256xf32, #tpu.memory_space<vmem>>, vector<8x128xf32>
    tpu.vector_store %arg4[%c0_8, %c0_9], %30 {strides = array<i32>} : memref<8x256xf32, #tpu.memory_space<vmem>>, vector<8x128xf32>,
    %c0_10 = arith.constant 0 : index
    %c128 = arith.constant 128 : index
    %32 = vector.load %arg4[%c0_10, %c128] : memref<8x256xf32, #tpu.memory_space<vmem>>, vector<8x128xf32>
    tpu.vector_store %arg4[%c0_10, %c128], %29 {strides = array<i32>} : memref<8x256xf32, #tpu.memory_space<vmem>>, vector<8x128xf32>,
    return
  }
  func.func @transform_0(%arg0: i32) -> (i32, i32) {
    %c0_i32 = arith.constant 0 : i32
    %c0_i32_0 = arith.constant 0 : i32
    return %arg0, %c0_i32 : i32, i32
  }
  func.func @transform_1(%arg0: i32) -> (i32, i32) {
    %c0_i32 = arith.constant 0 : i32
    %c0_i32_0 = arith.constant 0 : i32
    %c0_i32_1 = arith.constant 0 : i32
    return %c0_i32, %c0_i32_0 : i32, i32
  }
  func.func @transform_2(%arg0: i32) -> (i32, i32) {
    %c0_i32 = arith.constant 0 : i32
    %c0_i32_0 = arith.constant 0 : i32
    %c0_i32_1 = arith.constant 0 : i32
    return %c0_i32, %c0_i32_0 : i32, i32
  }
  func.func @transform_3(%arg0: i32) -> (i32, i32) {
    %c0_i32 = arith.constant 0 : i32
    %c0_i32_0 = arith.constant 0 : i32
    return %arg0, %c0_i32 : i32, i32
  }
}

</mosaic_0001>

<bundles_post_ra>
// kernel: tpu_custom_call.1
= control target key start
LH: loop header
LB: loop body
LE: loop exit
PB: predicated region body
PF: predicated region fallthrough
CT: control target
= control target key end

     0   :  { %8 = vsyncpa [#allocation3], 0  ;;  %s666_s0 = inlined_call_operand.hbm [shape: f32[8,256], index: 0, kind: input, shape index: {}, may-alias: {0,3}]   ;;  %s667_s1 = inlined_call_operand.hbm [shape: f32[256,512], index: 1, kind: input, shape index: {}]   ;;  %s668_s2 = inlined_call_operand.vmem [shape: f32[1,512], index: 2, kind: input, shape index: {}]   ;;  %s669_s3 = inlined_call_operand.hbm [shape: f32[8,256], index: 3, kind: output, shape index: {}, may-alias: {0,3}]  }
   0x1   :  { %9 = vsyncpa [#allocation6], 0 }
   0x2   :  { %10 = vsyncpa [#allocation4], 0  ;;  %s590_s12 = smov [#allocation2]   ;;  %s591_s14 = smov [#allocation5]  }
   0x3   :  { %s17_s13 = sshll.u32 %s590_s12, 4  ;;  %s26_s15 = sshll.u32 %s591_s14, 4  ;;  %s18_s13 = int_to_ptr.vmem [resolvable:$true] %s17_s13  ;;  %s615_s15 = int_to_ptr.vmem [resolvable:$true] %s26_s15 }
   0x4   :  { %s518_s18 = scalar_lea.hbm %s666_s0, 256 }
   0x5   :  { %p519_p0 = scmp.ne.s32.totalorder %s666_s0, %s518_s18  ;;  %p522_p1 = scmp.lt.u32.totalorder %s518_s18, %s666_s0 }
   0x7   :  { %p524_p2 = pnand %p522_p1, %p519_p0 }
   0x9   :  { %527 = shalt.err (!%p524_p2)
}
   0xa   :  { %s528_s23 = scalar_lea.vmem %s18_s13, 256  ;;  %p533_p4 = scmp.lt.s32.totalorder %s18_s13, %s18_s13 }
   0xb   :  { %p529_p3 = scmp.ne.s32.totalorder %s18_s13, %s528_s23  ;;  %p534_p5 = scmp.lt.s32.totalorder %s528_s23, %s528_s23 }
   0xd   :  { %p535_p6 = por %p534_p5, %p533_p4 }
   0xf   :  { %p536_p7 = pnand %p535_p6, %p529_p3 }
  0x11   :  { %539 = shalt.err (!%p536_p7)
}
  0x12   :  { %20 = dma.hbm_to_vmem [thread:$0]  %s666_s0, 256, %s18_s13, [#allocation3]  }
  0x13   :  { %s540_s28 = scalar_lea.hbm %s667_s1, 16384 }
  0x14   :  { %p541_p8 = scmp.ne.s32.totalorder %s667_s1, %s540_s28  ;;  %p544_p9 = scmp.lt.u32.totalorder %s540_s28, %s667_s1 }
  0x16   :  { %p546_p10 = pnand %p544_p9, %p541_p8 }
  0x18   :  { %549 = shalt.err (!%p546_p10)
}
  0x19   :  { %s550_s6 = scalar_lea.vmem %s615_s15, 16384  ;;  %p555_p12 = scmp.lt.s32.totalorder %s615_s15, %s615_s15 }
  0x1a   :  { %p551_p11 = scmp.ne.s32.totalorder %s615_s15, %s550_s6  ;;  %p556_p13 = scmp.lt.s32.totalorder %s550_s6, %s550_s6 }
  0x1c   :  { %p557_p0 = por %p556_p13, %p555_p12 }
  0x1e   :  { %p558_p1 = pnand %p557_p0, %p551_p11 }
  0x20   :  { %561 = shalt.err (!%p558_p1)
}
  0x21   :  { %s592_s0 = smov 512   ;;  %s593_s7 = smov 32  }
  0x22   :  { %32 = dma.hbm_to_vmem [thread:$0]  %s667_s1, 16384, %s615_s15, [#allocation6], %s592_s0, %s592_s0, %s593_s7  }
  0x23   :  { %584 = dma.done.wait [#allocation3], 256  }
  0x24   :  { %585 = vsyncadd [#allocation3], 4294967040 }
  0x25   :  { %586 = dma.done.wait [#allocation6], 16384  }
  0x26   :  { %587 = vsyncadd [#allocation6], 4294950912  ;;  %v44_v0 = vld [vmem:[#allocation5 + $0x8] sm:$0xff]  ;;  %v43_v2 = vld [vmem:[#allocation5] sm:$0xff] }
  0x27   :  { %v48_v1 = vld [vmem:[#allocation5 + $0x28] sm:$0xff]  ;;  %v47_v4 = vld [vmem:[#allocation5 + $0x20] sm:$0xff]  ;;  %v46_v21 = vld [vmem:[#allocation5 + $0x18] sm:$0xff] }
  0x28   :  { %v375_v3 = vpack.c.bf16 %v48_v1, %v44_v0  ;;  %v52_v5 = vld [vmem:[#allocation5 + $0x48] sm:$0xff]  ;;  %v377_v7 = vpack.c.bf16 %v47_v4, %v43_v2  ;;  %v51_v9 = vld [vmem:[#allocation5 + $0x40] sm:$0xff]  ;;  %v50_v25 = vld [vmem:[#allocation5 + $0x38] sm:$0xff] }
  0x29   :  { %v56_v6 = vld [vmem:[#allocation5 + $0x68] sm:$0xff]  ;;  %v55_v10 = vld [vmem:[#allocation5 + $0x60] sm:$0xff]  ;;  %v439_v27 = vpack.c.bf16 %v50_v25, %v46_v21  ;;  %v45_v28 = vld [vmem:[#allocation5 + $0x10] sm:$0xff] }
  0x2a   :  { %v379_v8 = vpack.c.bf16 %v56_v6, %v52_v5  ;;  %v60_v11 = vld [vmem:[#allocation5 + $0x88] sm:$0xff]  ;;  %376 = vmatprep.subr.bf16.mxu0 %v375_v3  ;;  %v381_v13 = vpack.c.bf16 %v55_v10, %v51_v9  ;;  %v59_v15 = vld [vmem:[#allocation5 + $0x80] sm:$0xff]  ;;  %v49_v29 = vld [vmem:[#allocation5 + $0x30] sm:$0xff] }
  0x2b   :  { %v64_v12 = vld [vmem:[#allocation5 + $0xa8] sm:$0xff]  ;;  %378 = vmatpush1.bf16.msra.mxu0 %v377_v7  ;;  %v63_v16 = vld [vmem:[#allocation5 + $0xa0] sm:$0xff]  ;;  %v441_v30 = vpack.c.bf16 %v49_v29, %v45_v28  ;;  %v54_v31 = vld [vmem:[#allocation5 + $0x58] sm:$0xff]  ;;  %440 = vmatprep.subr.bf16.mxu1 %v439_v27 }
  0x2c   :  { %380 = vmatprep.subr.bf16.mxu0 %v379_v8  ;;  %v383_v14 = vpack.c.bf16 %v64_v12, %v60_v11  ;;  %v68_v17 = vld [vmem:[#allocation5 + $0xc8] sm:$0xff]  ;;  %v385_v19 = vpack.c.bf16 %v63_v16, %v59_v15  ;;  %v67_v20 = vld [vmem:[#allocation5 + $0xc0] sm:$0xff]  ;;  %v58_v32 = vld [vmem:[#allocation5 + $0x78] sm:$0xff] }
  0x2d   :  { %v72_v18 = vld [vmem:[#allocation5 + $0xe8] sm:$0xff]  ;;  %v71_v23 = vld [vmem:[#allocation5 + $0xe0] sm:$0xff]  ;;  %v443_v35 = vpack.c.bf16 %v58_v32, %v54_v31  ;;  %v53_v36 = vld [vmem:[#allocation5 + $0x50] sm:$0xff]  ;;  %442 = vmatpush1.bf16.msra.mxu1 %v441_v30 }
  0x2e   :  { %v387_v22 = vpack.c.bf16 %v72_v18, %v68_v17  ;;  %v76_v24 = vld [vmem:[#allocation5 + $0x108] sm:$0xff]  ;;  %v389_v33 = vpack.c.bf16 %v71_v23, %v67_v20  ;;  %v75_v34 = vld [vmem:[#allocation5 + $0x100] sm:$0xff]  ;;  %v57_v40 = vld [vmem:[#allocation5 + $0x70] sm:$0xff] }
  0x2f   :  { %382 = vmatpush1.bf16.msra.mxu0 %v381_v13  ;;  %v80_v26 = vld [vmem:[#allocation5 + $0x128] sm:$0xff]  ;;  %v79_v38 = vld [vmem:[#allocation5 + $0x120] sm:$0xff]  ;;  %444 = vmatprep.subr.bf16.mxu1 %v443_v35  ;;  %v445_v42 = vpack.c.bf16 %v57_v40, %v53_v36  ;;  %v62_v43 = vld [vmem:[#allocation5 + $0x98] sm:$0xff] }
  0x30   :  { %384 = vmatprep.subr.bf16.mxu0 %v383_v14  ;;  %v391_v37 = vpack.c.bf16 %v80_v26, %v76_v24  ;;  %v84_v39 = vld [vmem:[#allocation5 + $0x148] sm:$0xff]  ;;  %v66_v44 = vld [vmem:[#allocation5 + $0xb8] sm:$0xff]  ;;  %v61_v46 = vld [vmem:[#allocation5 + $0x90] sm:$0xff]  ;;  %v393_v48 = vpack.c.bf16 %v79_v38, %v75_v34 }
  0x31   :  { %v88_v41 = vld [vmem:[#allocation5 + $0x168] sm:$0xff]  ;;  %v447_v45 = vpack.c.bf16 %v66_v44, %v62_v43  ;;  %v65_v47 = vld [vmem:[#allocation5 + $0xb0] sm:$0xff]  ;;  %v83_v49 = vld [vmem:[#allocation5 + $0x140] sm:$0xff]  ;;  %446 = vmatpush1.bf16.msra.mxu1 %v445_v42 }
  0x32   :  { %v70_v50 = vld [vmem:[#allocation5 + $0xd8] sm:$0xff]  ;;  %v395_v51 = vpack.c.bf16 %v88_v41, %v84_v39  ;;  %v87_v52 = vld [vmem:[#allocation5 + $0x160] sm:$0xff]  ;;  %v92_v53 = vld [vmem:[#allocation5 + $0x188] sm:$0xff]  ;;  %v449_v54 = vpack.c.bf16 %v65_v47, %v61_v46 }
  0x33   :  { %386 = vmatpush1.bf16.msra.mxu0 %v385_v19  ;;  %v74_v55 = vld [vmem:[#allocation5 + $0xf8] sm:$0xff]  ;;  %v96_v56 = vld [vmem:[#allocation5 + $0x1a8] sm:$0xff]  ;;  %448 = vmatprep.subr.bf16.mxu1 %v447_v45  ;;  %v69_v58 = vld [vmem:[#allocation5 + $0xd0] sm:$0xff]  ;;  %v397_v62 = vpack.c.bf16 %v87_v52, %v83_v49 }
  0x34   :  { %388 = vmatprep.subr.bf16.mxu0 %v387_v22  ;;  %v451_v57 = vpack.c.bf16 %v74_v55, %v70_v50  ;;  %v73_v59 = vld [vmem:[#allocation5 + $0xf0] sm:$0xff]  ;;  %v78_v60 = vld [vmem:[#allocation5 + $0x118] sm:$0xff]  ;;  %v399_v63 = vpack.c.bf16 %v96_v56, %v92_v53  ;;  %v91_v0 = vld [vmem:[#allocation5 + $0x180] sm:$0xff] }
  0x35   :  { %v82_v61 = vld [vmem:[#allocation5 + $0x138] sm:$0xff]  ;;  %v95_v1 = vld [vmem:[#allocation5 + $0x1a0] sm:$0xff]  ;;  %v100_v2 = vld [vmem:[#allocation5 + $0x1c8] sm:$0xff]  ;;  %450 = vmatpush1.bf16.msra.mxu1 %v449_v54  ;;  %v453_v3 = vpack.c.bf16 %v73_v59, %v69_v58 }
  0x36   :  { %v104_v4 = vld [vmem:[#allocation5 + $0x1e8] sm:$0xff]  ;;  %452 = vmatprep.subr.bf16.mxu1 %v451_v57  ;;  %v455_v5 = vpack.c.bf16 %v82_v61, %v78_v60  ;;  %v77_v6 = vld [vmem:[#allocation5 + $0x110] sm:$0xff]  ;;  %v86_v8 = vld [vmem:[#allocation5 + $0x158] sm:$0xff]  ;;  %v401_v10 = vpack.c.bf16 %v95_v1, %v91_v0 }
  0x37   :  { %390 = vmatpush1.bf16.msra.mxu0 %v389_v33  ;;  %v81_v7 = vld [vmem:[#allocation5 + $0x130] sm:$0xff]  ;;  %v90_v9 = vld [vmem:[#allocation5 + $0x178] sm:$0xff]  ;;  %v403_v11 = vpack.c.bf16 %v104_v4, %v100_v2  ;;  %v99_v12 = vld [vmem:[#allocation5 + $0x1c0] sm:$0xff] }
  0x38   :  { %392 = vmatprep.subr.bf16.mxu0 %v391_v37  ;;  %v103_v13 = vld [vmem:[#allocation5 + $0x1e0] sm:$0xff]  ;;  %v108_v14 = vld [vmem:[#allocation5 + $0x208] sm:$0xff]  ;;  %v457_v15 = vpack.c.bf16 %v81_v7, %v77_v6  ;;  %v459_v17 = vpack.c.bf16 %v90_v9, %v86_v8  ;;  %v85_v18 = vld [vmem:[#allocation5 + $0x150] sm:$0xff] }
  0x39   :  { %454 = vmatpush1.bf16.msra.mxu1 %v453_v3  ;;  %v112_v16 = vld [vmem:[#allocation5 + $0x228] sm:$0xff]  ;;  %v89_v19 = vld [vmem:[#allocation5 + $0x170] sm:$0xff]  ;;  %v94_v20 = vld [vmem:[#allocation5 + $0x198] sm:$0xff]  ;;  %v405_v22 = vpack.c.bf16 %v103_v13, %v99_v12 }
  0x3a   :  { %456 = vmatprep.subr.bf16.mxu1 %v455_v5  ;;  %v98_v21 = vld [vmem:[#allocation5 + $0x1b8] sm:$0xff]  ;;  %v407_v23 = vpack.c.bf16 %v112_v16, %v108_v14  ;;  %v107_v24 = vld [vmem:[#allocation5 + $0x200] sm:$0xff]  ;;  %v116_v26 = vld [vmem:[#allocation5 + $0x248] sm:$0xff]  ;;  %v461_v27 = vpack.c.bf16 %v89_v19, %v85_v18 }
  0x3b   :  { %394 = vmatpush1.bf16.msra.mxu0 %v393_v48  ;;  %v111_v25 = vld [vmem:[#allocation5 + $0x220] sm:$0xff]  ;;  %v120_v28 = vld [vmem:[#allocation5 + $0x268] sm:$0xff]  ;;  %v463_v29 = vpack.c.bf16 %v98_v21, %v94_v20  ;;  %v93_v30 = vld [vmem:[#allocation5 + $0x190] sm:$0xff] }
  0x3c   :  { %396 = vmatprep.subr.bf16.mxu0 %v395_v51  ;;  %v97_v31 = vld [vmem:[#allocation5 + $0x1b0] sm:$0xff]  ;;  %v102_v32 = vld [vmem:[#allocation5 + $0x1d8] sm:$0xff]  ;;  %v409_v34 = vpack.c.bf16 %v111_v25, %v107_v24  ;;  %v115_v35 = vld [vmem:[#allocation5 + $0x240] sm:$0xff]  ;;  %v411_v36 = vpack.c.bf16 %v120_v28, %v116_v26 }
  0x3d   :  { %458 = vmatpush1.bf16.msra.mxu1 %v457_v15  ;;  %v106_v33 = vld [vmem:[#allocation5 + $0x1f8] sm:$0xff]  ;;  %v119_v37 = vld [vmem:[#allocation5 + $0x260] sm:$0xff]  ;;  %v124_v38 = vld [vmem:[#allocation5 + $0x288] sm:$0xff]  ;;  %v465_v40 = vpack.c.bf16 %v97_v31, %v93_v30 }
  0x3e   :  { %460 = vmatprep.subr.bf16.mxu1 %v459_v17  ;;  %v128_v39 = vld [vmem:[#allocation5 + $0x2a8] sm:$0xff]  ;;  %v467_v41 = vpack.c.bf16 %v106_v33, %v102_v32  ;;  %v101_v42 = vld [vmem:[#allocation5 + $0x1d0] sm:$0xff]  ;;  %v646_v44 = vld [vmem:[#allocation2 + $0x8] sm:$0xff]  ;;  %v413_v47 = vpack.c.bf16 %v119_v37, %v115_v35 }
  0x3f   :  { %398 = vmatpush1.bf16.msra.mxu0 %v397_v62  ;;  %v105_v43 = vld [vmem:[#allocation5 + $0x1f0] sm:$0xff]  ;;  %v110_v45 = vld [vmem:[#allocation5 + $0x218] sm:$0xff]  ;;  %257 = vmatprep.mubr.f32.mxu0 %v646_v44  ;;  %v415_v48 = vpack.c.bf16 %v128_v39, %v124_v38  ;;  %v123_v49 = vld [vmem:[#allocation5 + $0x280] sm:$0xff] }
  0x40   :  { %400 = vmatprep.subr.bf16.mxu0 %v399_v63  ;;  %v114_v46 = vld [vmem:[#allocation5 + $0x238] sm:$0xff]  ;;  %328 = vmatprep.mubr.f32.mxu1 %v646_v44  ;;  %v127_v50 = vld [vmem:[#allocation5 + $0x2a0] sm:$0xff]  ;;  %v132_v51 = vld [vmem:[#allocation5 + $0x2c8] sm:$0xff]  ;;  %v469_v52 = vpack.c.bf16 %v105_v43, %v101_v42 }
  0x41   :  { %462 = vmatpush1.bf16.msra.mxu1 %v461_v27  ;;  %v136_v53 = vld [vmem:[#allocation5 + $0x2e8] sm:$0xff]  ;;  %v471_v54 = vpack.c.bf16 %v114_v46, %v110_v45  ;;  %v109_v55 = vld [vmem:[#allocation5 + $0x210] sm:$0xff]  ;;  %v118_v57 = vld [vmem:[#allocation5 + $0x258] sm:$0xff]  ;;  %v417_v59 = vpack.c.bf16 %v127_v50, %v123_v49 }
  0x42   :  { %464 = vmatprep.subr.bf16.mxu1 %v463_v29  ;;  %v113_v56 = vld [vmem:[#allocation5 + $0x230] sm:$0xff]  ;;  %v122_v58 = vld [vmem:[#allocation5 + $0x278] sm:$0xff]  ;;  %v419_v60 = vpack.c.bf16 %v136_v53, %v132_v51  ;;  %v131_v61 = vld [vmem:[#allocation5 + $0x2c0] sm:$0xff] }
  0x43   :  { %402 = vmatpush1.bf16.msra.mxu0 %v401_v10  ;;  %v135_v62 = vld [vmem:[#allocation5 + $0x2e0] sm:$0xff]  ;;  %v140_v63 = vld [vmem:[#allocation5 + $0x308] sm:$0xff]  ;;  %v473_v0 = vpack.c.bf16 %v113_v56, %v109_v55  ;;  %v475_v2 = vpack.c.bf16 %v122_v58, %v118_v57  ;;  %v117_v3 = vld [vmem:[#allocation5 + $0x250] sm:$0xff] }
  0x44   :  { %404 = vmatprep.subr.bf16.mxu0 %v403_v11  ;;  %v144_v1 = vld [vmem:[#allocation5 + $0x328] sm:$0xff]  ;;  %v121_v4 = vld [vmem:[#allocation5 + $0x270] sm:$0xff]  ;;  %v126_v5 = vld [vmem:[#allocation5 + $0x298] sm:$0xff]  ;;  %v421_v7 = vpack.c.bf16 %v135_v62, %v131_v61 }
  0x45   :  { %466 = vmatpush1.bf16.msra.mxu1 %v465_v40  ;;  %v130_v6 = vld [vmem:[#allocation5 + $0x2b8] sm:$0xff]  ;;  %v423_v8 = vpack.c.bf16 %v144_v1, %v140_v63  ;;  %v139_v9 = vld [vmem:[#allocation5 + $0x300] sm:$0xff]  ;;  %v148_v11 = vld [vmem:[#allocation5 + $0x348] sm:$0xff]  ;;  %v477_v12 = vpack.c.bf16 %v121_v4, %v117_v3  ;;  %v173_v3 = vlaneseq }
  0x46   :  { %468 = vmatprep.subr.bf16.mxu1 %v467_v41  ;;  %v143_v10 = vld [vmem:[#allocation5 + $0x320] sm:$0xff]  ;;  %v152_v13 = vld [vmem:[#allocation5 + $0x368] sm:$0xff]  ;;  %v479_v14 = vpack.c.bf16 %v130_v6, %v126_v5  ;;  %v125_v15 = vld [vmem:[#allocation5 + $0x290] sm:$0xff] }
  0x47   :  { %406 = vmatpush1.bf16.msra.mxu0 %v405_v22  ;;  %v129_v16 = vld [vmem:[#allocation5 + $0x2b0] sm:$0xff]  ;;  %v134_v17 = vld [vmem:[#allocation5 + $0x2d8] sm:$0xff]  ;;  %v425_v19 = vpack.c.bf16 %v143_v10, %v139_v9  ;;  %v427_v20 = vpack.c.bf16 %v152_v13, %v148_v11  ;;  %v147_v21 = vld [vmem:[#allocation5 + $0x340] sm:$0xff]  ;;  %v174_v4 = vshrl.u32 %v173_v3, 7 }
  0x48   :  { %408 = vmatprep.subr.bf16.mxu0 %v407_v23  ;;  %v138_v18 = vld [vmem:[#allocation5 + $0x2f8] sm:$0xff]  ;;  %v151_v22 = vld [vmem:[#allocation5 + $0x360] sm:$0xff]  ;;  %v156_v23 = vld [vmem:[#allocation5 + $0x388] sm:$0xff]  ;;  %v481_v24 = vpack.c.bf16 %v129_v16, %v125_v15 }
  0x49   :  { %470 = vmatpush1.bf16.msra.mxu1 %v469_v52  ;;  %v160_v25 = vld [vmem:[#allocation5 + $0x3a8] sm:$0xff]  ;;  %v483_v26 = vpack.c.bf16 %v138_v18, %v134_v17  ;;  %v133_v27 = vld [vmem:[#allocation5 + $0x2d0] sm:$0xff]  ;;  %v142_v29 = vld [vmem:[#allocation5 + $0x318] sm:$0xff]  ;;  %v429_v31 = vpack.c.bf16 %v151_v22, %v147_v21  ;;  %v175_v5 = vsub.s32 0, %v174_v4  ;;  %v183_v21 = vsub.s32 2, %v174_v4 }
  0x4a   :  { %472 = vmatprep.subr.bf16.mxu1 %v471_v54  ;;  %v137_v28 = vld [vmem:[#allocation5 + $0x2f0] sm:$0xff]  ;;  %v146_v30 = vld [vmem:[#allocation5 + $0x338] sm:$0xff]  ;;  %v431_v32 = vpack.c.bf16 %v160_v25, %v156_v23  ;;  %v155_v33 = vld [vmem:[#allocation5 + $0x380] sm:$0xff] }
  0x4b   :  { %410 = vmatpush1.bf16.msra.mxu0 %v409_v34  ;;  %v159_v34 = vld [vmem:[#allocation5 + $0x3a0] sm:$0xff]  ;;  %v164_v35 = vld [vmem:[#allocation5 + $0x3c8] sm:$0xff]  ;;  %v487_v38 = vpack.c.bf16 %v146_v30, %v142_v29  ;;  %v141_v39 = vld [vmem:[#allocation5 + $0x310] sm:$0xff] }
  0x4c   :  { %412 = vmatprep.subr.bf16.mxu0 %v411_v36  ;;  %v485_v36 = vpack.c.bf16 %v137_v28, %v133_v27  ;;  %v168_v37 = vld [vmem:[#allocation5 + $0x3e8] sm:$0xff]  ;;  %v145_v40 = vld [vmem:[#allocation5 + $0x330] sm:$0xff]  ;;  %v150_v41 = vld [vmem:[#allocation5 + $0x358] sm:$0xff]  ;;  %v433_v43 = vpack.c.bf16 %v159_v34, %v155_v33 }
  0x4d   :  { %474 = vmatpush1.bf16.msra.mxu1 %v473_v0  ;;  %v154_v42 = vld [vmem:[#allocation5 + $0x378] sm:$0xff]  ;;  %v435_v45 = vpack.c.bf16 %v168_v37, %v164_v35  ;;  %v163_v46 = vld [vmem:[#allocation5 + $0x3c0] sm:$0xff]  ;;  %v149_v50 = vld [vmem:[#allocation5 + $0x350] sm:$0xff] }
  0x4e   :  { %476 = vmatprep.subr.bf16.mxu1 %v475_v2  ;;  %v491_v49 = vpack.c.bf16 %v154_v42, %v150_v41  ;;  %v153_v51 = vld [vmem:[#allocation5 + $0x370] sm:$0xff]  ;;  %v158_v52 = vld [vmem:[#allocation5 + $0x398] sm:$0xff] }
  0x4f   :  { %414 = vmatpush1.bf16.msra.mxu0 %v413_v47  ;;  %v167_v47 = vld [vmem:[#allocation5 + $0x3e0] sm:$0xff]  ;;  %v162_v53 = vld [vmem:[#allocation5 + $0x3b8] sm:$0xff]  ;;  %v493_v55 = vpack.c.bf16 %v153_v51, %v149_v50  ;;  %v157_v57 = vld [vmem:[#allocation5 + $0x390] sm:$0xff] }
  0x50   :  { %416 = vmatprep.subr.bf16.mxu0 %v415_v48  ;;  %v489_v48 = vpack.c.bf16 %v145_v40, %v141_v39  ;;  %v437_v54 = vpack.c.bf16 %v167_v47, %v163_v46  ;;  %v495_v56 = vpack.c.bf16 %v162_v53, %v158_v52  ;;  %v161_v58 = vld [vmem:[#allocation5 + $0x3b0] sm:$0xff] }
  0x51   :  { %478 = vmatpush1.bf16.msra.mxu1 %v477_v12  ;;  %v41_v61 = vld [vmem:[#allocation2] sm:$0xff]  ;;  %v497_v62 = vpack.c.bf16 %v161_v58, %v157_v57 }
  0x52   :  { %480 = vmatprep.subr.bf16.mxu1 %v479_v14  ;;  %v165_v0 = vld [vmem:[#allocation5 + $0x3d0] sm:$0xff] }
  0x53   :  { %418 = vmatpush1.bf16.msra.mxu0 %v417_v59  ;;  %v166_v59 = vld [vmem:[#allocation5 + $0x3d8] sm:$0xff]  ;;  %v169_v1 = vld [vmem:[#allocation5 + $0x3f0] sm:$0xff] }
  0x54   :  { %420 = vmatprep.subr.bf16.mxu0 %v419_v60  ;;  %v170_v60 = vld [vmem:[#allocation5 + $0x3f8] sm:$0xff]  ;;  %v501_v2 = vpack.c.bf16 %v169_v1, %v165_v0  ;;  %v171_v6 = vld [vmem:[%s668_s2] sm:$0xf]  ;;  %s594_s2 = smov [#allocation7]  }
  0x55   :  { %482 = vmatpush1.bf16.msra.mxu1 %v481_v24  ;;  %v499_v63 = vpack.c.bf16 %v170_v60, %v166_v59  ;;  %v184_v25 = vrot.slane %v171_v6, %v183_v21  ;;  %s363_s11 = sshll.u32 %s594_s2, 4  ;;  %s364_s11 = int_to_ptr.vmem [resolvable:$true] %s363_s11 }
  0x56   :  { %484 = vmatprep.subr.bf16.mxu1 %v483_v26  ;;  %s562_s12 = scalar_lea.vmem %s364_s11, 256  ;;  %p567_p3 = scmp.lt.s32.totalorder %s364_s11, %s364_s11 }
  0x57   :  { %422 = vmatpush1.bf16.msra.mxu0 %v421_v7  ;;  %v179_v7 = vsub.s32 1, %v174_v4  ;;  %p563_p2 = scmp.ne.s32.totalorder %s364_s11, %s562_s12  ;;  %p568_p4 = scmp.lt.s32.totalorder %s562_s12, %s562_s12 }
  0x58   :  { %424 = vmatprep.subr.bf16.mxu0 %v423_v8  ;;  %v176_v8 = vrot.slane %v171_v6, %v175_v5 }
  0x59   :  { %486 = vmatpush1.bf16.msra.mxu1 %v485_v36  ;;  %v180_v10 = vrot.slane %v171_v6, %v179_v7  ;;  %p569_p5 = por %p568_p4, %p567_p3 }
  0x5a   :  { %488 = vmatprep.subr.bf16.mxu1 %v487_v38 }
  0x5b   :  { %426 = vmatpush1.bf16.msra.mxu0 %v425_v19  ;;  %p570_p6 = pnand %p569_p5, %p563_p2 }
  0x5c   :  { %428 = vmatprep.subr.bf16.mxu0 %v427_v20  ;;  %v187_v20 = vsub.s32 3, %v174_v4 }
  0x5d   :  { %490 = vmatpush1.bf16.msra.mxu1 %v489_v48 }
  0x5e   :  { %492 = vmatprep.subr.bf16.mxu1 %v491_v49  ;;  %v188_v22 = vrot.slane %v171_v6, %v187_v20 }
  0x5f   :  { %430 = vmatpush1.bf16.msra.mxu0 %v429_v31 }
  0x60   :  { %432 = vmatprep.subr.bf16.mxu0 %v431_v32 }
  0x61   :  { %494 = vmatpush1.bf16.msra.mxu1 %v493_v55 }
  0x62   :  { %496 = vmatprep.subr.bf16.mxu1 %v495_v56 }
  0x63   :  { %434 = vmatpush1.bf16.msra.mxu0 %v433_v43 }
  0x64   :  { %436 = vmatprep.subr.bf16.mxu0 %v435_v45 }
  0x65   :  { %498 = vmatpush1.bf16.msra.mxu1 %v497_v62 }
  0x66   :  { %500 = vmatprep.subr.bf16.mxu1 %v499_v63 }
  0x67   :  { %438 = vmatpush1.bf16.msra.mxu0 %v437_v54 }
  0x69   :  { %502 = vmatpush1.bf16.msra.mxu1 %v501_v2 }
  0x6a   :  { %258 = vmatmul.mubr.f32.vlgmr.msra.gmra.mrb[0].mxu0 %v41_v61 }
  0x6c   :  { %329 = vmatmul.mubr.f32.vlgmr.msra.gmra.mrb[0].mxu1 %v41_v61 }
 0x13d   :  { %v259_v9 = vpop.f32.mrb[0].mxu0 }
 0x13e   :  { %v260_v11 = vadd.f32 %v259_v9, %v176_v8  ;;  %v261_v12 = vpop.f32.mrb[1].mxu0 }
 0x13f   :  { %v262_v14 = vadd.f32 %v261_v12, %v180_v10  ;;  %v330_v16 = vpop.f32.mrb[0].mxu1 }
 0x140   :  { %v373_v13 = vmul.f32 -1.442695, %v260_v11  ;;  %v332_v17 = vpop.f32.mrb[1].mxu1  ;;  %v331_v28 = vadd.f32 %v330_v16, %v184_v25 }
 0x141   :  { %v374_v15 = vmul.f32 -1.442695, %v262_v14  ;;  %v333_v26 = vadd.f32 %v332_v17, %v188_v22 }
 0x142   :  { %508 = vpow2.f32 %v373_v13 }
 0x143   :  { %510 = vpow2.f32 %v374_v15 }
 0x14c   :  { %v509_v18 = vpop.eup %508 }
 0x14d   :  { %v338_v19 = vadd.f32 1.0, %v509_v18  ;;  %v511_v23 = vpop.eup %510 }
 0x14e   :  { %v344_v24 = vadd.f32 1.0, %v511_v23 }
 0x14f   :  { %512 = vrcp.f32 %v338_v19 }
 0x150   :  { %514 = vrcp.f32 %v344_v24 }
 0x159   :  { %v513_v27 = vpop.eup %512 }
 0x15a   :  { %v347_v29 = vmul.f32 %v513_v27, %v333_v26  ;;  %v515_v31 = vpop.eup %514 }
 0x15b   :  { %v350_v32 = vsub.f32 1.0, %v515_v31  ;;  %v352_v35 = vmul.f32 %v515_v31, %v646_v44 }
 0x15c   :  { %v348_v30 = vadd.f32 %v347_v29, %v331_v28 }
 0x15e   :  { %516 = vtanh.f32 %v348_v30 }
 0x168   :  { %v517_v33 = vpop.eup %516 }
 0x169   :  { %v351_v34 = vmul.f32 %v517_v33, %v350_v32 }
 0x16b   :  { %v353_v36 = vadd.f32 %v352_v35, %v351_v34 }
 0x16d   :  { %v354_v37 = vadd.f32 %v353_v36, %v41_v61  ;;  %356 = vst [vmem:[#allocation7 + $0x8] sm:$0xff] %v353_v36 }
 0x16f   :  { %355 = vst [vmem:[#allocation7] sm:$0xff] %v354_v37 }
 0x170   :  { %573 = shalt.err (!%p570_p6)
}
 0x171   :  { %s574_s15 = scalar_lea.hbm %s669_s3, 256 }
 0x172   :  { %p575_p7 = scmp.ne.s32.totalorder %s669_s3, %s574_s15  ;;  %p578_p8 = scmp.lt.u32.totalorder %s574_s15, %s669_s3 }
 0x174   :  { %p580_p9 = pnand %p578_p8, %p575_p7 }
 0x176   :  { %583 = shalt.err (!%p580_p9)
}
 0x177   :  { %366 = dma.vmem_to_hbm [thread:$0]  %s364_s11, 256, %s669_s3, [#allocation4]  }
 0x178   :  { %588 = dma.done.wait [#allocation4], 256  }
 0x179   :  { %589 = vsyncadd [#allocation4], 4294967040 }
 0x17a   :  { %370 = vsyncpa [#allocation3], 1 }
 0x17b   :  { %371 = vsyncpa [#allocation6], 1 }
 0x17c   :  { %372 = vsyncpa [#allocation4], 1 }

</bundles_post_ra>
